<compile_context>
chip_gen: v6e
topology: v6e:2x2x1
jax: 0.10.0
libtpu: 0.0.40
codegen_flags: <defaults>
</compile_context>

<pallas_src>
import jax
import jax.numpy as jnp
from jax import lax
from jax.experimental import pallas as pl
from jax.experimental.pallas import tpu as pltpu


def _gru_kernel(gi_ref, h0_ref, whh_ref, bhh_ref, len_ref, out_ref, h_scr):
    """One grid step == T_CHUNK timesteps of the GRU recurrence.

    gi_ref  : (T_CHUNK, B, 3H) precomputed input projections x W_ih + b_ih
    h0_ref  : (B, H)           initial hidden state (broadcast of learned h0)
    whh_ref : (H, 3H)          fused hidden->hidden weights, gate order (r,z,n)
    bhh_ref : (1, 3H)          fused hidden biases
    len_ref : (B, 1) int32     valid sequence lengths
    out_ref : (B, H)           last-valid hidden state per sequence
    h_scr   : (B, H) f32       hidden-state carry across time chunks
    """
    t_chunk = gi_ref.shape[0]
    H = out_ref.shape[1]
    c = pl.program_id(0)

    @pl.when(c == 0)
    def _():
        h_scr[...] = h0_ref[...]

    # Hoisted once per chunk (not per timestep).
    whh = whh_ref[...]          # (H, 3H)
    bhh = bhh_ref[...]          # (1, 3H)
    lens = len_ref[...]         # (B, 1) int32
    t0 = c * t_chunk

    def step(i, h):
        gi = gi_ref[i]          # (B, 3H)
        gh = jnp.dot(h, whh, preferred_element_type=jnp.float32) + bhh
        r = jax.nn.sigmoid(gi[:, :H] + gh[:, :H])
        z = jax.nn.sigmoid(gi[:, H:2 * H] + gh[:, H:2 * H])
        n = jnp.tanh(gi[:, 2 * H:] + r * gh[:, 2 * H:])
        h_new = n + z * (h - n)           # == (1 - z) * n + z * h
        # Freeze h once t >= length: final h equals the hidden state at
        # t = length - 1 (packed-sequence semantics for a uni-dir GRU).
        return jnp.where(t0 + i < lens, h_new, h)

    h = lax.fori_loop(0, t_chunk, step, h_scr[...], unroll=True)
    h_scr[...] = h
    out_ref[...] = h.astype(out_ref.dtype)


def gru_recurrence(gi_tbg, h0_bh, w_hh, b_hh, lengths, *, t_chunk=None):
    """Runs the GRU recurrence; returns the last valid hidden state (B, H)."""
    T, B, G = gi_tbg.shape
    H = h0_bh.shape[-1]
    assert G == 3 * H
    if t_chunk is None:
        t_chunk = min(T, 16)
    num_chunks = pl.cdiv(T, t_chunk)

    grid_spec = pltpu.PrefetchScalarGridSpec(
        num_scalar_prefetch=0,
        grid=(num_chunks,),
        in_specs=[
            pl.BlockSpec((t_chunk, B, G), lambda c: (c, 0, 0)),   # gi chunk
            pl.BlockSpec((B, H), lambda c: (0, 0)),               # h0
            pl.BlockSpec((H, G), lambda c: (0, 0)),               # W_hh fused
            pl.BlockSpec((1, G), lambda c: (0, 0)),               # b_hh fused
            pl.BlockSpec((B, 1), lambda c: (0, 0)),               # lengths
        ],
        out_specs=pl.BlockSpec((B, H), lambda c: (0, 0)),          # resident acc
        scratch_shapes=[pltpu.VMEM((B, H), jnp.float32)],
    )

    return pl.pallas_call(
        _gru_kernel,
        out_shape=jax.ShapeDtypeStruct((B, H), jnp.float32),
        grid_spec=grid_spec,
        compiler_params=pltpu.CompilerParams(
            dimension_semantics=("arbitrary",)),   # sequential recurrence
    )(
        gi_tbg.astype(jnp.float32),
        h0_bh.astype(jnp.float32),
        w_hh.astype(jnp.float32),
        b_hh.reshape(1, G).astype(jnp.float32),
        lengths.reshape(B, 1).astype(jnp.int32),
    )


def caption_encoder_forward(params, caps, lengths, *, t_chunk=None):
    """Full CaptionEncoder.forward.

    caps    : (B, T) int32 token ids
    lengths : (B,)   int32 valid lengths (1 <= length <= T)
    returns : (B, H) hidden state of the GRU at t = length - 1 per sequence
    """
    emb_table = params["emb_table"]          # (V, D)
    h0 = params["h0"]                        # (1, 1, H)
    B, T = caps.shape
    H = h0.shape[-1]

    # Embedding lookup, produced directly in time-major layout (T, B, D):
    # transpose the tiny int32 id matrix instead of the activations.
    emb_tbd = jnp.take(emb_table, caps.T, axis=0).astype(jnp.float32)   # (T,B,D)

    # Hoisted input projection: one large (T*B, D) x (D, 3H) matmul done once,
    # outside the sequential recurrence.
    gi = jnp.einsum("tbd,dg->tbg", emb_tbd, params["w_ih"],
                    preferred_element_type=jnp.float32) + params["b_ih"]  # (T,B,3H)

    h0_bh = jnp.broadcast_to(h0[0, 0], (B, H)).astype(jnp.float32)

    # NOTE: if lengths could be 0 the result would be h0 for that row (PyTorch
    # pack_padded_sequence would raise instead); spec guarantees length >= 1.
    return gru_recurrence(gi, h0_bh, params["w_hh"], params["b_hh"],
                          lengths, t_chunk=t_chunk)


def _reference_forward(params, caps, lengths):
    """Pure-JAX reference (lax.scan) for validation."""
    emb_table = params["emb_table"]
    h0 = params["h0"]
    B, T = caps.shape
    H = h0.shape[-1]
    x = jnp.take(emb_table, caps, axis=0).astype(jnp.float32)   # (B, T, D)
    h = jnp.broadcast_to(h0[0, 0], (B, H)).astype(jnp.float32)

    w_ih, w_hh, b_ih, b_hh = (params["w_ih"], params["w_hh"],
                              params["b_ih"], params["b_hh"])

    def step(h, x_t):
        gi = x_t @ w_ih + b_ih
        gh = h @ w_hh + b_hh
        r = jax.nn.sigmoid(gi[:, :H] + gh[:, :H])
        z = jax.nn.sigmoid(gi[:, H:2 * H] + gh[:, H:2 * H])
        n = jnp.tanh(gi[:, 2 * H:] + r * gh[:, 2 * H:])
        h_new = (1.0 - z) * n + z * h
        return h_new, h_new

    _, outs = lax.scan(step, h, jnp.transpose(x, (1, 0, 2)))    # (T, B, H)
    last_idx = (lengths - 1).astype(jnp.int32)
    return outs[last_idx, jnp.arange(B)]


def init_params(key, vocab_size, word_dim, emb_size):
    """Deterministic synthetic parameters (shapes from CaptionEncoder.__init__),
    with the three GRU gates (r, z, n) fused along the output axis."""
    ks = jax.random.split(key, 6)
    scale = 0.1
    return {
        "emb_table": scale * jax.random.normal(ks[0], (vocab_size, word_dim), jnp.float32),
        "w_ih": scale * jax.random.normal(ks[1], (word_dim, 3 * emb_size), jnp.float32),
        "w_hh": scale * jax.random.normal(ks[2], (emb_size, 3 * emb_size), jnp.float32),
        "b_ih": scale * jax.random.normal(ks[3], (3 * emb_size,), jnp.float32),
        "b_hh": scale * jax.random.normal(ks[4], (3 * emb_size,), jnp.float32),
        "h0": scale * jax.random.normal(ks[5], (1, 1, emb_size), jnp.float32),
    }


if __name__ == "__main__":
    key = jax.random.PRNGKey(0)
    B, T = 2, 8            # batch, seq
    vocab_size = 50
    word_dim = 16          # "word_dim"
    emb_size = 32          # GRU hidden "emb_size"

    k_par, k_caps, k_len = jax.random.split(key, 3)
    params = init_params(k_par, vocab_size, word_dim, emb_size)

    caps = jax.random.randint(k_caps, (B, T), 0, vocab_size, dtype=jnp.int32)
    lengths = jnp.array([T, T - 3], dtype=jnp.int32)   # valid lengths, 1..T

    out = caption_encoder_forward(params, caps, lengths)
    out = jax.block_until_ready(out)

    ref = _reference_forward(params, caps, lengths)
    assert out.shape == (B, emb_size)
    assert jnp.allclose(out, ref, atol=1e-4, rtol=1e-4), "mismatch vs reference"

    print("KERNEL_OK")
</pallas_src>

<mosaic_0001>
module attributes {stable_mosaic.version = 11 : i64} {
  func.func @_gru_kernel(%arg0: i32, %arg1: memref<8x2x96xf32, #tpu.memory_space<vmem>>, %arg2: memref<2x32xf32, #tpu.memory_space<vmem>>, %arg3: memref<32x96xf32, #tpu.memory_space<vmem>>, %arg4: memref<1x96xf32, #tpu.memory_space<vmem>>, %arg5: memref<2x1xi32, #tpu.memory_space<vmem>>, %arg6: memref<2x32xf32, #tpu.memory_space<vmem>>, %arg7: memref<2x32xf32, #tpu.memory_space<vmem>>) attributes {dimension_semantics = [#tpu.dimension_semantics<arbitrary>], iteration_bounds = array<i64: 1>, scalar_prefetch = 0 : i64, scratch_operands = 1 : i64, tpu.core_type = #tpu.core_type<tc>, window_params = [{transform_indices = @transform_0, window_bounds = array<i64: 8, 2, 96>}, {pipeline_mode = #tpu.pipeline_mode<synchronous>, transform_indices = @transform_1, window_bounds = array<i64: 2, 32>}, {pipeline_mode = #tpu.pipeline_mode<synchronous>, transform_indices = @transform_2, window_bounds = array<i64: 32, 96>}, {pipeline_mode = #tpu.pipeline_mode<synchronous>, transform_indices = @transform_3, window_bounds = array<i64: 1, 96>}, {pipeline_mode = #tpu.pipeline_mode<synchronous>, transform_indices = @transform_4, window_bounds = array<i64: 2, 1>}, {pipeline_mode = #tpu.pipeline_mode<synchronous>, transform_indices = @transform_5, window_bounds = array<i64: 2, 32>}]} {
    %c0_i32 = arith.constant 0 : i32
    %0 = arith.cmpi eq, %arg0, %c0_i32 : i32
    %1 = arith.extui %0 : i1 to i32
    %c0_i32_0 = arith.constant 0 : i32
    %2 = arith.cmpi ne, %1, %c0_i32_0 : i32
    scf.if %2 {
      %c0_53 = arith.constant 0 : index
      %c0_54 = arith.constant 0 : index
      %298 = vector.load %arg2[%c0_53, %c0_54] : memref<2x32xf32, #tpu.memory_space<vmem>>, vector<2x32xf32>
      %c0_55 = arith.constant 0 : index
      %c0_56 = arith.constant 0 : index
      %299 = vector.load %arg7[%c0_55, %c0_56] : memref<2x32xf32, #tpu.memory_space<vmem>>, vector<2x32xf32>
      tpu.vector_store %arg7[%c0_55, %c0_56], %298 {strides = array<i32>} : memref<2x32xf32, #tpu.memory_space<vmem>>, vector<2x32xf32>,
    } else {
    }
    %c0 = arith.constant 0 : index
    %c0_1 = arith.constant 0 : index
    %3 = vector.load %arg3[%c0, %c0_1] : memref<32x96xf32, #tpu.memory_space<vmem>>, vector<32x96xf32>
    %c0_2 = arith.constant 0 : index
    %c0_3 = arith.constant 0 : index
    %4 = vector.load %arg4[%c0_2, %c0_3] : memref<1x96xf32, #tpu.memory_space<vmem>>, vector<1x96xf32>
    %c0_4 = arith.constant 0 : index
    %c0_5 = arith.constant 0 : index
    %5 = vector.load %arg5[%c0_4, %c0_5] : memref<2x1xi32, #tpu.memory_space<vmem>>, vector<2x1xi32>
    %c8_i32 = arith.constant 8 : i32
    %6 = arith.muli %arg0, %c8_i32 : i32
    %c0_6 = arith.constant 0 : index
    %c0_7 = arith.constant 0 : index
    %7 = vector.load %arg7[%c0_6, %c0_7] : memref<2x32xf32, #tpu.memory_space<vmem>>, vector<2x32xf32>
    %c0_i32_8 = arith.constant 0 : i32
    %8 = arith.index_cast %c0_i32_8 : i32 to index
    %c0_9 = arith.constant 0 : index
    %c0_10 = arith.constant 0 : index
    %9 = vector.load %arg1[%8, %c0_9, %c0_10] : memref<8x2x96xf32, #tpu.memory_space<vmem>>, vector<1x2x96xf32>
    %10 = vector.shape_cast %9 : vector<1x2x96xf32> to vector<2x96xf32>
    %cst = arith.constant dense<0.000000e+00> : vector<2x96xf32>
    %11 = tpu.matmul %7, %3, %cst {dimension_numbers = #tpu.dot_dimension_numbers<[1], [0], [0], [1], [0, 0, 1, 1], [], []>} : vector<2x32xf32>, vector<32x96xf32>, vector<2x96xf32> -> vector<2x96xf32>
    %12 = vector.broadcast %4 : vector<1x96xf32> to vector<2x96xf32>
    %13 = arith.addf %11, %12 : vector<2x96xf32>
    %14 = vector.extract_strided_slice %10 {offsets = [0, 0], sizes = [2, 32], strides = [1, 1]} : vector<2x96xf32> to vector<2x32xf32>
    %15 = vector.extract_strided_slice %13 {offsets = [0, 0], sizes = [2, 32], strides = [1, 1]} : vector<2x96xf32> to vector<2x32xf32>
    %16 = arith.addf %14, %15 : vector<2x32xf32>
    %17 = arith.negf %16 : vector<2x32xf32>
    %18 = math.exp %17 : vector<2x32xf32>
    %cst_11 = arith.constant 1.000000e+00 : f32
    %19 = vector.broadcast %cst_11 : f32 to vector<2x32xf32>
    %20 = arith.addf %19, %18 : vector<2x32xf32>
    %21 = arith.divf %19, %20 : vector<2x32xf32>
    %22 = vector.extract_strided_slice %10 {offsets = [0, 32], sizes = [2, 32], strides = [1, 1]} : vector<2x96xf32> to vector<2x32xf32>
    %23 = vector.extract_strided_slice %13 {offsets = [0, 32], sizes = [2, 32], strides = [1, 1]} : vector<2x96xf32> to vector<2x32xf32>
    %24 = arith.addf %22, %23 : vector<2x32xf32>
    %25 = arith.negf %24 : vector<2x32xf32>
    %26 = math.exp %25 : vector<2x32xf32>
    %cst_12 = arith.constant 1.000000e+00 : f32
    %27 = vector.broadcast %cst_12 : f32 to vector<2x32xf32>
    %28 = arith.addf %27, %26 : vector<2x32xf32>
    %29 = arith.divf %27, %28 : vector<2x32xf32>
    %30 = vector.extract_strided_slice %10 {offsets = [0, 64], sizes = [2, 32], strides = [1, 1]} : vector<2x96xf32> to vector<2x32xf32>
    %31 = vector.extract_strided_slice %13 {offsets = [0, 64], sizes = [2, 32], strides = [1, 1]} : vector<2x96xf32> to vector<2x32xf32>
    %32 = arith.mulf %21, %31 : vector<2x32xf32>
    %33 = arith.addf %30, %32 : vector<2x32xf32>
    %34 = math.tanh %33 : vector<2x32xf32>
    %35 = arith.subf %7, %34 : vector<2x32xf32>
    %36 = arith.mulf %29, %35 : vector<2x32xf32>
    %37 = arith.addf %34, %36 : vector<2x32xf32>
    %38 = arith.addi %6, %c0_i32_8 : i32
    %39 = vector.broadcast %38 : i32 to vector<2x1xi32>
    %40 = arith.cmpi slt, %39, %5 : vector<2x1xi32>
    %41 = vector.shape_cast %40 : vector<2x1xi1> to vector<2x1xi1>
    %42 = vector.broadcast %41 : vector<2x1xi1> to vector<2x32xi1>
    %43 = arith.select %42, %37, %7 : vector<2x32xi1>, vector<2x32xf32>
    %c1_i32 = arith.constant 1 : i32
    %44 = arith.index_cast %c1_i32 : i32 to index
    %c0_13 = arith.constant 0 : index
    %c0_14 = arith.constant 0 : index
    %45 = vector.load %arg1[%44, %c0_13, %c0_14] : memref<8x2x96xf32, #tpu.memory_space<vmem>>, vector<1x2x96xf32>
    %46 = vector.shape_cast %45 : vector<1x2x96xf32> to vector<2x96xf32>
    %cst_15 = arith.constant dense<0.000000e+00> : vector<2x96xf32>
    %47 = tpu.matmul %43, %3, %cst_15 {dimension_numbers = #tpu.dot_dimension_numbers<[1], [0], [0], [1], [0, 0, 1, 1], [], []>} : vector<2x32xf32>, vector<32x96xf32>, vector<2x96xf32> -> vector<2x96xf32>
    %48 = vector.broadcast %4 : vector<1x96xf32> to vector<2x96xf32>
    %49 = arith.addf %47, %48 : vector<2x96xf32>
    %50 = vector.extract_strided_slice %46 {offsets = [0, 0], sizes = [2, 32], strides = [1, 1]} : vector<2x96xf32> to vector<2x32xf32>
    %51 = vector.extract_strided_slice %49 {offsets = [0, 0], sizes = [2, 32], strides = [1, 1]} : vector<2x96xf32> to vector<2x32xf32>
    %52 = arith.addf %50, %51 : vector<2x32xf32>
    %53 = arith.negf %52 : vector<2x32xf32>
    %54 = math.exp %53 : vector<2x32xf32>
    %cst_16 = arith.constant 1.000000e+00 : f32
    %55 = vector.broadcast %cst_16 : f32 to vector<2x32xf32>
    %56 = arith.addf %55, %54 : vector<2x32xf32>
    %57 = arith.divf %55, %56 : vector<2x32xf32>
    %58 = vector.extract_strided_slice %46 {offsets = [0, 32], sizes = [2, 32], strides = [1, 1]} : vector<2x96xf32> to vector<2x32xf32>
    %59 = vector.extract_strided_slice %49 {offsets = [0, 32], sizes = [2, 32], strides = [1, 1]} : vector<2x96xf32> to vector<2x32xf32>
    %60 = arith.addf %58, %59 : vector<2x32xf32>
    %61 = arith.negf %60 : vector<2x32xf32>
    %62 = math.exp %61 : vector<2x32xf32>
    %cst_17 = arith.constant 1.000000e+00 : f32
    %63 = vector.broadcast %cst_17 : f32 to vector<2x32xf32>
    %64 = arith.addf %63, %62 : vector<2x32xf32>
    %65 = arith.divf %63, %64 : vector<2x32xf32>
    %66 = vector.extract_strided_slice %46 {offsets = [0, 64], sizes = [2, 32], strides = [1, 1]} : vector<2x96xf32> to vector<2x32xf32>
    %67 = vector.extract_strided_slice %49 {offsets = [0, 64], sizes = [2, 32], strides = [1, 1]} : vector<2x96xf32> to vector<2x32xf32>
    %68 = arith.mulf %57, %67 : vector<2x32xf32>
    %69 = arith.addf %66, %68 : vector<2x32xf32>
    %70 = math.tanh %69 : vector<2x32xf32>
    %71 = arith.subf %43, %70 : vector<2x32xf32>
    %72 = arith.mulf %65, %71 : vector<2x32xf32>
    %73 = arith.addf %70, %72 : vector<2x32xf32>
    %74 = arith.addi %6, %c1_i32 : i32
    %75 = vector.broadcast %74 : i32 to vector<2x1xi32>
    %76 = arith.cmpi slt, %75, %5 : vector<2x1xi32>
    %77 = vector.shape_cast %76 : vector<2x1xi1> to vector<2x1xi1>
    %78 = vector.broadcast %77 : vector<2x1xi1> to vector<2x32xi1>
    %79 = arith.select %78, %73, %43 : vector<2x32xi1>, vector<2x32xf32>
    %c2_i32 = arith.constant 2 : i32
    %80 = arith.index_cast %c2_i32 : i32 to index
    %c0_18 = arith.constant 0 : index
    %c0_19 = arith.constant 0 : index
    %81 = vector.load %arg1[%80, %c0_18, %c0_19] : memref<8x2x96xf32, #tpu.memory_space<vmem>>, vector<1x2x96xf32>
    %82 = vector.shape_cast %81 : vector<1x2x96xf32> to vector<2x96xf32>
    %cst_20 = arith.constant dense<0.000000e+00> : vector<2x96xf32>
    %83 = tpu.matmul %79, %3, %cst_20 {dimension_numbers = #tpu.dot_dimension_numbers<[1], [0], [0], [1], [0, 0, 1, 1], [], []>} : vector<2x32xf32>, vector<32x96xf32>, vector<2x96xf32> -> vector<2x96xf32>
    %84 = vector.broadcast %4 : vector<1x96xf32> to vector<2x96xf32>
    %85 = arith.addf %83, %84 : vector<2x96xf32>
    %86 = vector.extract_strided_slice %82 {offsets = [0, 0], sizes = [2, 32], strides = [1, 1]} : vector<2x96xf32> to vector<2x32xf32>
    %87 = vector.extract_strided_slice %85 {offsets = [0, 0], sizes = [2, 32], strides = [1, 1]} : vector<2x96xf32> to vector<2x32xf32>
    %88 = arith.addf %86, %87 : vector<2x32xf32>
    %89 = arith.negf %88 : vector<2x32xf32>
    %90 = math.exp %89 : vector<2x32xf32>
    %cst_21 = arith.constant 1.000000e+00 : f32
    %91 = vector.broadcast %cst_21 : f32 to vector<2x32xf32>
    %92 = arith.addf %91, %90 : vector<2x32xf32>
    %93 = arith.divf %91, %92 : vector<2x32xf32>
    %94 = vector.extract_strided_slice %82 {offsets = [0, 32], sizes = [2, 32], strides = [1, 1]} : vector<2x96xf32> to vector<2x32xf32>
    %95 = vector.extract_strided_slice %85 {offsets = [0, 32], sizes = [2, 32], strides = [1, 1]} : vector<2x96xf32> to vector<2x32xf32>
    %96 = arith.addf %94, %95 : vector<2x32xf32>
    %97 = arith.negf %96 : vector<2x32xf32>
    %98 = math.exp %97 : vector<2x32xf32>
    %cst_22 = arith.constant 1.000000e+00 : f32
    %99 = vector.broadcast %cst_22 : f32 to vector<2x32xf32>
    %100 = arith.addf %99, %98 : vector<2x32xf32>
    %101 = arith.divf %99, %100 : vector<2x32xf32>
    %102 = vector.extract_strided_slice %82 {offsets = [0, 64], sizes = [2, 32], strides = [1, 1]} : vector<2x96xf32> to vector<2x32xf32>
    %103 = vector.extract_strided_slice %85 {offsets = [0, 64], sizes = [2, 32], strides = [1, 1]} : vector<2x96xf32> to vector<2x32xf32>
    %104 = arith.mulf %93, %103 : vector<2x32xf32>
    %105 = arith.addf %102, %104 : vector<2x32xf32>
    %106 = math.tanh %105 : vector<2x32xf32>
    %107 = arith.subf %79, %106 : vector<2x32xf32>
    %108 = arith.mulf %101, %107 : vector<2x32xf32>
    %109 = arith.addf %106, %108 : vector<2x32xf32>
    %110 = arith.addi %6, %c2_i32 : i32
    %111 = vector.broadcast %110 : i32 to vector<2x1xi32>
    %112 = arith.cmpi slt, %111, %5 : vector<2x1xi32>
    %113 = vector.shape_cast %112 : vector<2x1xi1> to vector<2x1xi1>
    %114 = vector.broadcast %113 : vector<2x1xi1> to vector<2x32xi1>
    %115 = arith.select %114, %109, %79 : vector<2x32xi1>, vector<2x32xf32>
    %c3_i32 = arith.constant 3 : i32
    %116 = arith.index_cast %c3_i32 : i32 to index
    %c0_23 = arith.constant 0 : index
    %c0_24 = arith.constant 0 : index
    %117 = vector.load %arg1[%116, %c0_23, %c0_24] : memref<8x2x96xf32, #tpu.memory_space<vmem>>, vector<1x2x96xf32>
    %118 = vector.shape_cast %117 : vector<1x2x96xf32> to vector<2x96xf32>
    %cst_25 = arith.constant dense<0.000000e+00> : vector<2x96xf32>
    %119 = tpu.matmul %115, %3, %cst_25 {dimension_numbers = #tpu.dot_dimension_numbers<[1], [0], [0], [1], [0, 0, 1, 1], [], []>} : vector<2x32xf32>, vector<32x96xf32>, vector<2x96xf32> -> vector<2x96xf32>
    %120 = vector.broadcast %4 : vector<1x96xf32> to vector<2x96xf32>
    %121 = arith.addf %119, %120 : vector<2x96xf32>
    %122 = vector.extract_strided_slice %118 {offsets = [0, 0], sizes = [2, 32], strides = [1, 1]} : vector<2x96xf32> to vector<2x32xf32>
    %123 = vector.extract_strided_slice %121 {offsets = [0, 0], sizes = [2, 32], strides = [1, 1]} : vector<2x96xf32> to vector<2x32xf32>
    %124 = arith.addf %122, %123 : vector<2x32xf32>
    %125 = arith.negf %124 : vector<2x32xf32>
    %126 = math.exp %125 : vector<2x32xf32>
    %cst_26 = arith.constant 1.000000e+00 : f32
    %127 = vector.broadcast %cst_26 : f32 to vector<2x32xf32>
    %128 = arith.addf %127, %126 : vector<2x32xf32>
    %129 = arith.divf %127, %128 : vector<2x32xf32>
    %130 = vector.extract_strided_slice %118 {offsets = [0, 32], sizes = [2, 32], strides = [1, 1]} : vector<2x96xf32> to vector<2x32xf32>
    %131 = vector.extract_strided_slice %121 {offsets = [0, 32], sizes = [2, 32], strides = [1, 1]} : vector<2x96xf32> to vector<2x32xf32>
    %132 = arith.addf %130, %131 : vector<2x32xf32>
    %133 = arith.negf %132 : vector<2x32xf32>
    %134 = math.exp %133 : vector<2x32xf32>
    %cst_27 = arith.constant 1.000000e+00 : f32
    %135 = vector.broadcast %cst_27 : f32 to vector<2x32xf32>
    %136 = arith.addf %135, %134 : vector<2x32xf32>
    %137 = arith.divf %135, %136 : vector<2x32xf32>
    %138 = vector.extract_strided_slice %118 {offsets = [0, 64], sizes = [2, 32], strides = [1, 1]} : vector<2x96xf32> to vector<2x32xf32>
    %139 = vector.extract_strided_slice %121 {offsets = [0, 64], sizes = [2, 32], strides = [1, 1]} : vector<2x96xf32> to vector<2x32xf32>
    %140 = arith.mulf %129, %139 : vector<2x32xf32>
    %141 = arith.addf %138, %140 : vector<2x32xf32>
    %142 = math.tanh %141 : vector<2x32xf32>
    %143 = arith.subf %115, %142 : vector<2x32xf32>
    %144 = arith.mulf %137, %143 : vector<2x32xf32>
    %145 = arith.addf %142, %144 : vector<2x32xf32>
    %146 = arith.addi %6, %c3_i32 : i32
    %147 = vector.broadcast %146 : i32 to vector<2x1xi32>
    %148 = arith.cmpi slt, %147, %5 : vector<2x1xi32>
    %149 = vector.shape_cast %148 : vector<2x1xi1> to vector<2x1xi1>
    %150 = vector.broadcast %149 : vector<2x1xi1> to vector<2x32xi1>
    %151 = arith.select %150, %145, %115 : vector<2x32xi1>, vector<2x32xf32>
    %c4_i32 = arith.constant 4 : i32
    %152 = arith.index_cast %c4_i32 : i32 to index
    %c0_28 = arith.constant 0 : index
    %c0_29 = arith.constant 0 : index
    %153 = vector.load %arg1[%152, %c0_28, %c0_29] : memref<8x2x96xf32, #tpu.memory_space<vmem>>, vector<1x2x96xf32>
    %154 = vector.shape_cast %153 : vector<1x2x96xf32> to vector<2x96xf32>
    %cst_30 = arith.constant dense<0.000000e+00> : vector<2x96xf32>
    %155 = tpu.matmul %151, %3, %cst_30 {dimension_numbers = #tpu.dot_dimension_numbers<[1], [0], [0], [1], [0, 0, 1, 1], [], []>} : vector<2x32xf32>, vector<32x96xf32>, vector<2x96xf32> -> vector<2x96xf32>
    %156 = vector.broadcast %4 : vector<1x96xf32> to vector<2x96xf32>
    %157 = arith.addf %155, %156 : vector<2x96xf32>
    %158 = vector.extract_strided_slice %154 {offsets = [0, 0], sizes = [2, 32], strides = [1, 1]} : vector<2x96xf32> to vector<2x32xf32>
    %159 = vector.extract_strided_slice %157 {offsets = [0, 0], sizes = [2, 32], strides = [1, 1]} : vector<2x96xf32> to vector<2x32xf32>
    %160 = arith.addf %158, %159 : vector<2x32xf32>
    %161 = arith.negf %160 : vector<2x32xf32>
    %162 = math.exp %161 : vector<2x32xf32>
    %cst_31 = arith.constant 1.000000e+00 : f32
    %163 = vector.broadcast %cst_31 : f32 to vector<2x32xf32>
    %164 = arith.addf %163, %162 : vector<2x32xf32>
    %165 = arith.divf %163, %164 : vector<2x32xf32>
    %166 = vector.extract_strided_slice %154 {offsets = [0, 32], sizes = [2, 32], strides = [1, 1]} : vector<2x96xf32> to vector<2x32xf32>
    %167 = vector.extract_strided_slice %157 {offsets = [0, 32], sizes = [2, 32], strides = [1, 1]} : vector<2x96xf32> to vector<2x32xf32>
    %168 = arith.addf %166, %167 : vector<2x32xf32>
    %169 = arith.negf %168 : vector<2x32xf32>
    %170 = math.exp %169 : vector<2x32xf32>
    %cst_32 = arith.constant 1.000000e+00 : f32
    %171 = vector.broadcast %cst_32 : f32 to vector<2x32xf32>
    %172 = arith.addf %171, %170 : vector<2x32xf32>
    %173 = arith.divf %171, %172 : vector<2x32xf32>
    %174 = vector.extract_strided_slice %154 {offsets = [0, 64], sizes = [2, 32], strides = [1, 1]} : vector<2x96xf32> to vector<2x32xf32>
    %175 = vector.extract_strided_slice %157 {offsets = [0, 64], sizes = [2, 32], strides = [1, 1]} : vector<2x96xf32> to vector<2x32xf32>
    %176 = arith.mulf %165, %175 : vector<2x32xf32>
    %177 = arith.addf %174, %176 : vector<2x32xf32>
    %178 = math.tanh %177 : vector<2x32xf32>
    %179 = arith.subf %151, %178 : vector<2x32xf32>
    %180 = arith.mulf %173, %179 : vector<2x32xf32>
    %181 = arith.addf %178, %180 : vector<2x32xf32>
    %182 = arith.addi %6, %c4_i32 : i32
    %183 = vector.broadcast %182 : i32 to vector<2x1xi32>
    %184 = arith.cmpi slt, %183, %5 : vector<2x1xi32>
    %185 = vector.shape_cast %184 : vector<2x1xi1> to vector<2x1xi1>
    %186 = vector.broadcast %185 : vector<2x1xi1> to vector<2x32xi1>
    %187 = arith.select %186, %181, %151 : vector<2x32xi1>, vector<2x32xf32>
    %c5_i32 = arith.constant 5 : i32
    %188 = arith.index_cast %c5_i32 : i32 to index
    %c0_33 = arith.constant 0 : index
    %c0_34 = arith.constant 0 : index
    %189 = vector.load %arg1[%188, %c0_33, %c0_34] : memref<8x2x96xf32, #tpu.memory_space<vmem>>, vector<1x2x96xf32>
    %190 = vector.shape_cast %189 : vector<1x2x96xf32> to vector<2x96xf32>
    %cst_35 = arith.constant dense<0.000000e+00> : vector<2x96xf32>
    %191 = tpu.matmul %187, %3, %cst_35 {dimension_numbers = #tpu.dot_dimension_numbers<[1], [0], [0], [1], [0, 0, 1, 1], [], []>} : vector<2x32xf32>, vector<32x96xf32>, vector<2x96xf32> -> vector<2x96xf32>
    %192 = vector.broadcast %4 : vector<1x96xf32> to vector<2x96xf32>
    %193 = arith.addf %191, %192 : vector<2x96xf32>
    %194 = vector.extract_strided_slice %190 {offsets = [0, 0], sizes = [2, 32], strides = [1, 1]} : vector<2x96xf32> to vector<2x32xf32>
    %195 = vector.extract_strided_slice %193 {offsets = [0, 0], sizes = [2, 32], strides = [1, 1]} : vector<2x96xf32> to vector<2x32xf32>
    %196 = arith.addf %194, %195 : vector<2x32xf32>
    %197 = arith.negf %196 : vector<2x32xf32>
    %198 = math.exp %197 : vector<2x32xf32>
    %cst_36 = arith.constant 1.000000e+00 : f32
    %199 = vector.broadcast %cst_36 : f32 to vector<2x32xf32>
    %200 = arith.addf %199, %198 : vector<2x32xf32>
    %201 = arith.divf %199, %200 : vector<2x32xf32>
    %202 = vector.extract_strided_slice %190 {offsets = [0, 32], sizes = [2, 32], strides = [1, 1]} : vector<2x96xf32> to vector<2x32xf32>
    %203 = vector.extract_strided_slice %193 {offsets = [0, 32], sizes = [2, 32], strides = [1, 1]} : vector<2x96xf32> to vector<2x32xf32>
    %204 = arith.addf %202, %203 : vector<2x32xf32>
    %205 = arith.negf %204 : vector<2x32xf32>
    %206 = math.exp %205 : vector<2x32xf32>
    %cst_37 = arith.constant 1.000000e+00 : f32
    %207 = vector.broadcast %cst_37 : f32 to vector<2x32xf32>
    %208 = arith.addf %207, %206 : vector<2x32xf32>
    %209 = arith.divf %207, %208 : vector<2x32xf32>
    %210 = vector.extract_strided_slice %190 {offsets = [0, 64], sizes = [2, 32], strides = [1, 1]} : vector<2x96xf32> to vector<2x32xf32>
    %211 = vector.extract_strided_slice %193 {offsets = [0, 64], sizes = [2, 32], strides = [1, 1]} : vector<2x96xf32> to vector<2x32xf32>
    %212 = arith.mulf %201, %211 : vector<2x32xf32>
    %213 = arith.addf %210, %212 : vector<2x32xf32>
    %214 = math.tanh %213 : vector<2x32xf32>
    %215 = arith.subf %187, %214 : vector<2x32xf32>
    %216 = arith.mulf %209, %215 : vector<2x32xf32>
    %217 = arith.addf %214, %216 : vector<2x32xf32>
    %218 = arith.addi %6, %c5_i32 : i32
    %219 = vector.broadcast %218 : i32 to vector<2x1xi32>
    %220 = arith.cmpi slt, %219, %5 : vector<2x1xi32>
    %221 = vector.shape_cast %220 : vector<2x1xi1> to vector<2x1xi1>
    %222 = vector.broadcast %221 : vector<2x1xi1> to vector<2x32xi1>
    %223 = arith.select %222, %217, %187 : vector<2x32xi1>, vector<2x32xf32>
    %c6_i32 = arith.constant 6 : i32
    %224 = arith.index_cast %c6_i32 : i32 to index
    %c0_38 = arith.constant 0 : index
    %c0_39 = arith.constant 0 : index
    %225 = vector.load %arg1[%224, %c0_38, %c0_39] : memref<8x2x96xf32, #tpu.memory_space<vmem>>, vector<1x2x96xf32>
    %226 = vector.shape_cast %225 : vector<1x2x96xf32> to vector<2x96xf32>
    %cst_40 = arith.constant dense<0.000000e+00> : vector<2x96xf32>
    %227 = tpu.matmul %223, %3, %cst_40 {dimension_numbers = #tpu.dot_dimension_numbers<[1], [0], [0], [1], [0, 0, 1, 1], [], []>} : vector<2x32xf32>, vector<32x96xf32>, vector<2x96xf32> -> vector<2x96xf32>
    %228 = vector.broadcast %4 : vector<1x96xf32> to vector<2x96xf32>
    %229 = arith.addf %227, %228 : vector<2x96xf32>
    %230 = vector.extract_strided_slice %226 {offsets = [0, 0], sizes = [2, 32], strides = [1, 1]} : vector<2x96xf32> to vector<2x32xf32>
    %231 = vector.extract_strided_slice %229 {offsets = [0, 0], sizes = [2, 32], strides = [1, 1]} : vector<2x96xf32> to vector<2x32xf32>
    %232 = arith.addf %230, %231 : vector<2x32xf32>
    %233 = arith.negf %232 : vector<2x32xf32>
    %234 = math.exp %233 : vector<2x32xf32>
    %cst_41 = arith.constant 1.000000e+00 : f32
    %235 = vector.broadcast %cst_41 : f32 to vector<2x32xf32>
    %236 = arith.addf %235, %234 : vector<2x32xf32>
    %237 = arith.divf %235, %236 : vector<2x32xf32>
    %238 = vector.extract_strided_slice %226 {offsets = [0, 32], sizes = [2, 32], strides = [1, 1]} : vector<2x96xf32> to vector<2x32xf32>
    %239 = vector.extract_strided_slice %229 {offsets = [0, 32], sizes = [2, 32], strides = [1, 1]} : vector<2x96xf32> to vector<2x32xf32>
    %240 = arith.addf %238, %239 : vector<2x32xf32>
    %241 = arith.negf %240 : vector<2x32xf32>
    %242 = math.exp %241 : vector<2x32xf32>
    %cst_42 = arith.constant 1.000000e+00 : f32
    %243 = vector.broadcast %cst_42 : f32 to vector<2x32xf32>
    %244 = arith.addf %243, %242 : vector<2x32xf32>
    %245 = arith.divf %243, %244 : vector<2x32xf32>
    %246 = vector.extract_strided_slice %226 {offsets = [0, 64], sizes = [2, 32], strides = [1, 1]} : vector<2x96xf32> to vector<2x32xf32>
    %247 = vector.extract_strided_slice %229 {offsets = [0, 64], sizes = [2, 32], strides = [1, 1]} : vector<2x96xf32> to vector<2x32xf32>
    %248 = arith.mulf %237, %247 : vector<2x32xf32>
    %249 = arith.addf %246, %248 : vector<2x32xf32>
    %250 = math.tanh %249 : vector<2x32xf32>
    %251 = arith.subf %223, %250 : vector<2x32xf32>
    %252 = arith.mulf %245, %251 : vector<2x32xf32>
    %253 = arith.addf %250, %252 : vector<2x32xf32>
    %254 = arith.addi %6, %c6_i32 : i32
    %255 = vector.broadcast %254 : i32 to vector<2x1xi32>
    %256 = arith.cmpi slt, %255, %5 : vector<2x1xi32>
    %257 = vector.shape_cast %256 : vector<2x1xi1> to vector<2x1xi1>
    %258 = vector.broadcast %257 : vector<2x1xi1> to vector<2x32xi1>
    %259 = arith.select %258, %253, %223 : vector<2x32xi1>, vector<2x32xf32>
    %c7_i32 = arith.constant 7 : i32
    %260 = arith.index_cast %c7_i32 : i32 to index
    %c0_43 = arith.constant 0 : index
    %c0_44 = arith.constant 0 : index
    %261 = vector.load %arg1[%260, %c0_43, %c0_44] : memref<8x2x96xf32, #tpu.memory_space<vmem>>, vector<1x2x96xf32>
    %262 = vector.shape_cast %261 : vector<1x2x96xf32> to vector<2x96xf32>
    %cst_45 = arith.constant dense<0.000000e+00> : vector<2x96xf32>
    %263 = tpu.matmul %259, %3, %cst_45 {dimension_numbers = #tpu.dot_dimension_numbers<[1], [0], [0], [1], [0, 0, 1, 1], [], []>} : vector<2x32xf32>, vector<32x96xf32>, vector<2x96xf32> -> vector<2x96xf32>
    %264 = vector.broadcast %4 : vector<1x96xf32> to vector<2x96xf32>
    %265 = arith.addf %263, %264 : vector<2x96xf32>
    %266 = vector.extract_strided_slice %262 {offsets = [0, 0], sizes = [2, 32], strides = [1, 1]} : vector<2x96xf32> to vector<2x32xf32>
    %267 = vector.extract_strided_slice %265 {offsets = [0, 0], sizes = [2, 32], strides = [1, 1]} : vector<2x96xf32> to vector<2x32xf32>
    %268 = arith.addf %266, %267 : vector<2x32xf32>
    %269 = arith.negf %268 : vector<2x32xf32>
    %270 = math.exp %269 : vector<2x32xf32>
    %cst_46 = arith.constant 1.000000e+00 : f32
    %271 = vector.broadcast %cst_46 : f32 to vector<2x32xf32>
    %272 = arith.addf %271, %270 : vector<2x32xf32>
    %273 = arith.divf %271, %272 : vector<2x32xf32>
    %274 = vector.extract_strided_slice %262 {offsets = [0, 32], sizes = [2, 32], strides = [1, 1]} : vector<2x96xf32> to vector<2x32xf32>
    %275 = vector.extract_strided_slice %265 {offsets = [0, 32], sizes = [2, 32], strides = [1, 1]} : vector<2x96xf32> to vector<2x32xf32>
    %276 = arith.addf %274, %275 : vector<2x32xf32>
    %277 = arith.negf %276 : vector<2x32xf32>
    %278 = math.exp %277 : vector<2x32xf32>
    %cst_47 = arith.constant 1.000000e+00 : f32
    %279 = vector.broadcast %cst_47 : f32 to vector<2x32xf32>
    %280 = arith.addf %279, %278 : vector<2x32xf32>
    %281 = arith.divf %279, %280 : vector<2x32xf32>
    %282 = vector.extract_strided_slice %262 {offsets = [0, 64], sizes = [2, 32], strides = [1, 1]} : vector<2x96xf32> to vector<2x32xf32>
    %283 = vector.extract_strided_slice %265 {offsets = [0, 64], sizes = [2, 32], strides = [1, 1]} : vector<2x96xf32> to vector<2x32xf32>
    %284 = arith.mulf %273, %283 : vector<2x32xf32>
    %285 = arith.addf %282, %284 : vector<2x32xf32>
    %286 = math.tanh %285 : vector<2x32xf32>
    %287 = arith.subf %259, %286 : vector<2x32xf32>
    %288 = arith.mulf %281, %287 : vector<2x32xf32>
    %289 = arith.addf %286, %288 : vector<2x32xf32>
    %290 = arith.addi %6, %c7_i32 : i32
    %291 = vector.broadcast %290 : i32 to vector<2x1xi32>
    %292 = arith.cmpi slt, %291, %5 : vector<2x1xi32>
    %293 = vector.shape_cast %292 : vector<2x1xi1> to vector<2x1xi1>
    %294 = vector.broadcast %293 : vector<2x1xi1> to vector<2x32xi1>
    %295 = arith.select %294, %289, %259 : vector<2x32xi1>, vector<2x32xf32>
    %c8_i32_48 = arith.constant 8 : i32
    %c0_49 = arith.constant 0 : index
    %c0_50 = arith.constant 0 : index
    %296 = vector.load %arg7[%c0_49, %c0_50] : memref<2x32xf32, #tpu.memory_space<vmem>>, vector<2x32xf32>
    tpu.vector_store %arg7[%c0_49, %c0_50], %295 {strides = array<i32>} : memref<2x32xf32, #tpu.memory_space<vmem>>, vector<2x32xf32>,
    %c0_51 = arith.constant 0 : index
    %c0_52 = arith.constant 0 : index
    %297 = vector.load %arg6[%c0_51, %c0_52] : memref<2x32xf32, #tpu.memory_space<vmem>>, vector<2x32xf32>
    tpu.vector_store %arg6[%c0_51, %c0_52], %295 {strides = array<i32>} : memref<2x32xf32, #tpu.memory_space<vmem>>, vector<2x32xf32>,
    return
  }
  func.func @transform_0(%arg0: i32) -> (i32, i32, i32) {
    %c0_i32 = arith.constant 0 : i32
    %c0_i32_0 = arith.constant 0 : i32
    %c0_i32_1 = arith.constant 0 : i32
    return %arg0, %c0_i32, %c0_i32_0 : i32, i32, i32
  }
  func.func @transform_1(%arg0: i32) -> (i32, i32) {
    %c0_i32 = arith.constant 0 : i32
    %c0_i32_0 = arith.constant 0 : i32
    %c0_i32_1 = arith.constant 0 : i32
    return %c0_i32, %c0_i32_0 : i32, i32
  }
  func.func @transform_2(%arg0: i32) -> (i32, i32) {
    %c0_i32 = arith.constant 0 : i32
    %c0_i32_0 = arith.constant 0 : i32
    %c0_i32_1 = arith.constant 0 : i32
    return %c0_i32, %c0_i32_0 : i32, i32
  }
  func.func @transform_3(%arg0: i32) -> (i32, i32) {
    %c0_i32 = arith.constant 0 : i32
    %c0_i32_0 = arith.constant 0 : i32
    %c0_i32_1 = arith.constant 0 : i32
    return %c0_i32, %c0_i32_0 : i32, i32
  }
  func.func @transform_4(%arg0: i32) -> (i32, i32) {
    %c0_i32 = arith.constant 0 : i32
    %c0_i32_0 = arith.constant 0 : i32
    %c0_i32_1 = arith.constant 0 : i32
    return %c0_i32, %c0_i32_0 : i32, i32
  }
  func.func @transform_5(%arg0: i32) -> (i32, i32) {
    %c0_i32 = arith.constant 0 : i32
    %c0_i32_0 = arith.constant 0 : i32
    %c0_i32_1 = arith.constant 0 : i32
    return %c0_i32, %c0_i32_0 : i32, i32
  }
}

</mosaic_0001>

<bundles_post_ra>
// kernel: tpu_custom_call.1
= control target key start
LH: loop header
LB: loop body
LE: loop exit
PB: predicated region body
PF: predicated region fallthrough
CT: control target
= control target key end

     0   :  { %10 = vsyncpa [#allocation4], 0  ;;  %s1529_s0 = inlined_call_operand.hbm [shape: f32[8,2,96], index: 0, kind: input, shape index: {}]   ;;  %s1530_s1 = inlined_call_operand.vmem [shape: f32[2,32], index: 1, kind: input, shape index: {}]   ;;  %s1531_s2 = inlined_call_operand.hbm [shape: f32[32,96], index: 2, kind: input, shape index: {}]   ;;  %s1532_s3 = inlined_call_operand.vmem [shape: f32[1,96], index: 3, kind: input, shape index: {}]   ;;  %s1533_s4 = inlined_call_operand.vmem [shape: s32[2,1], index: 4, kind: input, shape index: {}]   ;;  %s1534_s5 = inlined_call_operand.hbm [shape: f32[2,32], index: 5, kind: output, shape index: {}]  }
   0x1   :  { %11 = vsyncpa [#allocation7], 0 }
   0x2   :  { %12 = vsyncpa [#allocation5], 0  ;;  %s1297_s18 = smov [#allocation3]  }
   0x3   :  { %s18_s19 = sshll.u32 %s1297_s18, 4  ;;  %s19_s19 = int_to_ptr.vmem [resolvable:$true] %s18_s19 }
   0x4   :  { %s1239_s20 = scalar_lea.vmem %s19_s19, 256  ;;  %p1244_p1 = scmp.lt.s32.totalorder %s19_s19, %s19_s19 }
   0x5   :  { %p1240_p0 = scmp.ne.s32.totalorder %s19_s19, %s1239_s20  ;;  %p1245_p2 = scmp.lt.s32.totalorder %s1239_s20, %s1239_s20 }
   0x7   :  { %p1246_p3 = por %p1245_p2, %p1244_p1 }
   0x9   :  { %p1247_p4 = pnand %p1246_p3, %p1240_p0 }
   0xb   :  { %1250 = shalt.err (!%p1247_p4)
}
   0xc   :  { %s1298_s21 = smov 32   ;;  %s1299_s22 = smov 2  }
   0xd   :  { %24 = dma.hbm_to_vmem [thread:$0]  %s1529_s0, 256, %s19_s19, [#allocation4], %s1298_s21, %s1298_s21, %s1299_s22  }
   0xe   :  { %s1300_s25 = smov [#allocation6]  }
   0xf   :  { %s32_s26 = sshll.u32 %s1300_s25, 4  ;;  %s33_s26 = int_to_ptr.vmem [resolvable:$true] %s32_s26 }
  0x10   :  { %s1259_s27 = scalar_lea.vmem %s33_s26, 512  ;;  %p1264_p6 = scmp.lt.s32.totalorder %s33_s26, %s33_s26 }
  0x11   :  { %p1260_p5 = scmp.ne.s32.totalorder %s33_s26, %s1259_s27  ;;  %p1265_p7 = scmp.lt.s32.totalorder %s1259_s27, %s1259_s27 }
  0x13   :  { %p1266_p8 = por %p1265_p7, %p1264_p6 }
  0x15   :  { %p1267_p9 = pnand %p1266_p8, %p1260_p5 }
  0x17   :  { %1270 = shalt.err (!%p1267_p9)
}
  0x18   :  { %s1301_s28 = smov 128   ;;  %s1302_s29 = smov 8  }
  0x19   :  { %38 = dma.hbm_to_vmem [thread:$0]  %s1531_s2, 512, %s33_s26, [#allocation7], %s1301_s28, %s1301_s28, %s1302_s29  }
  0x1a   :  { %1291 = dma.done.wait [#allocation4], 256  }
  0x1b   :  { %1292 = vsyncadd [#allocation4], 4294967040 }
  0x1c   :  { %1293 = dma.done.wait [#allocation7], 512  }
  0x1d   :  { %1294 = vsyncadd [#allocation7], 4294966784  ;;  %v1303_v0 = vmov 0.0   ;;  %vm1304_vm0 = vmmov 0   ;;  %vm54_vm1 = vcmask 254976   ;;  %v1353_v1 = vld [vmem:[#allocation6 + $0x18] sm:$0xff] }
  0x1e   :  { %1082 = vmatprep.subr.mxu0 %v1303_v0  ;;  %1090 = vmatprep.mubr.msk.f32.mxu0 %vm1304_vm0, %v1303_v0  ;;  %v1355_v2 = vld [vmem:[#allocation6 + $0x10] sm:$0xff]  ;;  %v53_v3 = vld [vmem:[%s1530_s1] sm:$0x3]  ;;  %v1370_v5 = vld [vmem:[#allocation6] sm:$0xff]  ;;  %vm71_vm2 = vcmask 261120   ;;  %s1305_s8 = smov 64  }
  0x1f   :  { %1093 = vmatprep.subr.mxu1 %v1303_v0  ;;  %1101 = vmatprep.mubr.msk.f32.mxu1 %vm1304_vm0, %v1303_v0  ;;  %v1363_v4 = vld [vmem:[#allocation6 + $0x8] sm:$0xff]  ;;  %55 = vst.msk [vmem:[#allocation2] sm:$0x3] %vm54_vm1, %v53_v3  ;;  %v64_v11 = vld [vmem:[#allocation3] sm:$0x3]  ;;  %v1306_v22 = vmov 0  }
  0x20   :  { %1083 = vmatpush3.msra.mxu0 %v1353_v1  ;;  %1094 = vmatpush3.msra.mxu1 %v1353_v1  ;;  %v1395_v7 = vld [vmem:[%s1532_s3] ss:$0 sm:$0xff]  ;;  %v190_v38 = vld [vmem:[#allocation3 + $0x2] sm:$0x3]  ;;  %v305_v61 = vld [vmem:[#allocation3 + $0x4] sm:$0x3] }
  0x21   :  { %1084 = vmatprep.subr.mxu0 %v1303_v0  ;;  %1095 = vmatprep.subr.mxu1 %v1303_v0  ;;  %v1403_v21 = vld [vmem:[%s1533_s4] sm:$0x3]  ;;  %s1307_s4 = smov 96   ;;  %s1308_s10 = smov [#allocation8]  }
  0x22   :  { %1085 = vmatpush3.msra.mxu0 %v1355_v2  ;;  %1096 = vmatpush3.msra.mxu1 %v1355_v2  ;;  %vm1020_vm3 = vcmp.gt.s32.totalorder %v1403_v21, 0  ;;  %vm1023_vm5 = vcmp.gt.s32.totalorder %v1403_v21, 1  ;;  %vm1026_vm7 = vcmp.gt.s32.totalorder %v1403_v21, 2  ;;  %vm1029_vm9 = vcmp.gt.s32.totalorder %v1403_v21, 3  ;;  %s1007_s11 = sshll.u32 %s1308_s10, 4  ;;  %s1008_s11 = int_to_ptr.vmem [resolvable:$true] %s1007_s11 }
  0x23   :  { %1086 = vmatprep.subr.mxu0 %v1303_v0  ;;  %1097 = vmatprep.subr.mxu1 %v1303_v0  ;;  %v180_v23 = vsel %vm1020_vm3, 1, %v1306_v22  ;;  %v298_v46 = vsel %vm1023_vm5, 1, %v1306_v22  ;;  %vm1032_vm11 = vcmp.gt.s32.totalorder %v1403_v21, 4  ;;  %vm1035_vm13 = vcmp.gt.s32.totalorder %v1403_v21, 5  ;;  %s1271_s12 = scalar_lea.vmem %s1008_s11, 32  ;;  %p1276_p11 = scmp.lt.s32.totalorder %s1008_s11, %s1008_s11 }
  0x24   :  { %1087 = vmatpush3.msra.mxu0 %v1363_v4  ;;  %1098 = vmatpush3.msra.mxu1 %v1363_v4  ;;  %vm1038_vm15 = vcmp.gt.s32.totalorder %v1403_v21, 6  ;;  %vm1041_vm3 = vcmp.gt.s32.totalorder %v1403_v21, 7  ;;  %p1272_p10 = scmp.ne.s32.totalorder %s1008_s11, %s1271_s12  ;;  %p1277_p12 = scmp.lt.s32.totalorder %s1271_s12, %s1271_s12 }
  0x25   :  { %1088 = vmatprep.subr.mxu0 %v1303_v0  ;;  %1099 = vmatprep.subr.mxu1 %v1303_v0 }
  0x26   :  { %1089 = vmatpush3.msra.mxu0 %v1370_v5  ;;  %1100 = vmatpush3.msra.mxu1 %v1370_v5  ;;  %v63_v6 = vld [vmem:[#allocation2] sm:$0x3]  ;;  %p1278_p13 = por %p1277_p12, %p1276_p11 }
  0x27   :  { %1104 = vmatprep.subr.mxu0 %v1303_v0  ;;  %1115 = vmatprep.subr.mxu1 %v1303_v0 }
  0x28   :  { %1091 = vmatmul.mubr.msk.f32.vlgmr.msra.gmra.mxu0 %vm71_vm2, %v63_v6  ;;  %1182 = vset.pattern.permute.xlu0 %v1306_v22  ;;  %p1279_p0 = pnand %p1278_p13, %p1272_p10 }
  0x29   :  { %1105 = vmatpush3.msra.mxu0 %v1353_v1  ;;  %1112 = vmatprep.mubr.msk.f32.mxu0 %vm1304_vm0, %v1303_v0 }
  0x2a   :  { %1106 = vmatprep.subr.mxu0 %v1303_v0 }
  0x2b   :  { %1107 = vmatpush3.msra.mxu0 %v1355_v2 }
  0x2c   :  { %1108 = vmatprep.subr.mxu0 %v1303_v0 }
  0x2d   :  { %1109 = vmatpush3.msra.mxu0 %v1363_v4 }
  0x2e   :  { %1110 = vmatprep.subr.mxu0 %v1303_v0 }
  0x2f   :  { %1111 = vmatpush3.msra.mxu0 %v1370_v5 }
  0x30   :  { %1126 = vmatprep.subr.mxu0 %v1303_v0 }
  0xe8   :  { %v141_v8 = vpop.f32.mrf.mxu0 }
  0xe9   :  { %v142_v9 = vadd.f32 %v1395_v7, %v141_v8 }
  0xea   :  { %v1092_v10 = vpop.f32.mrf.mxu0 }
  0xeb   :  { %153 = vrot.lane.b32.xlu0 %v142_v9, %s1305_s8  ;;  %v145_v12 = vadd.f32 %v142_v9, %v64_v11 }
  0xed   :  { %v1019_v13 = vmul.f32 -1.442695, %v145_v12 }
  0xef   :  { %1183 = vpow2.f32 %v1019_v13 }
  0xfc   :  { %v1184_v14 = vpop.eup %1183 }
  0xfd   :  { %v149_v15 = vadd.f32 1.0, %v1184_v14 }
  0xff   :  { %1185 = vrcp.f32 %v149_v15 }
 0x10c   :  { %v1186_v16 = vpop.eup %1185 }
 0x15d   :  { %v154_v17 = vpop.permute.xlu0 %153 }
 0x15e   :  { %v156_v18 = vmul.f32 %v1186_v16, %v154_v17 }
 0x160   :  { %158 = vrot.lane.b32.xlu0 %v156_v18, %s1305_s8 }
 0x164   :  { %182 = vperm.xlu0 %1182, %v180_v23  }
 0x1d2   :  { %v159_v19 = vpop.permute.xlu0 %158 }
 0x1d3   :  { %v161_v20 = vadd.f32 %v159_v19, %v64_v11  ;;  %v413_v11 = vsel %vm1026_vm7, 1, %v1306_v22 }
 0x1d5   :  { %1187 = vtanh.f32 %v161_v20 }
 0x1df   :  { %v183_v29 = vpop.permute.xlu0 %182 }
 0x1e0   :  { %vm184_vm4 = vcmp.eq.s32.totalorder %v183_v29, 1 }
 0x1e2   :  { %v1188_v24 = vpop.eup %1187 }
 0x1e3   :  { %164 = vrot.lane.b32.xlu1 %v1188_v24, %s1305_s8 }
 0x255   :  { %v165_v25 = vpop.permute.xlu1 %164 }
 0x256   :  { %v167_v26 = vsub.f32 %v63_v6, %v165_v25 }
 0x258   :  { %169 = vrot.lane.b32.xlu1 %v167_v26, %s1298_s21 }
 0x2ca   :  { %v170_v27 = vpop.permute.xlu1 %169 }
 0x2cb   :  { %v172_v28 = vmul.f32 %v1186_v16, %v170_v27 }
 0x2cd   :  { %174 = vrot.lane.b32.xlu1 %v172_v28, %s1298_s21  ;;  %v420_v28 = vld [vmem:[#allocation3 + $0x6] sm:$0x3] }
 0x2d1   :  { %185 = vrot.lane.b32.xlu1 %v63_v6, %s1305_s8 }
 0x33f   :  { %v175_v30 = vpop.permute.xlu1 %174 }
 0x340   :  { %v177_v31 = vadd.f32 %v1188_v24, %v175_v30 }
 0x343   :  { %v186_v32 = vpop.permute.xlu1 %185 }
 0x344   :  { %v188_v33 = vsel %vm184_vm4, %v177_v31, %v186_v32 }
 0x345   :  { %192 = vrot.lane.b32.xlu0 %v188_v33, %s1305_s8 }
 0x3b7   :  { %v193_v34 = vpop.permute.xlu0 %192 }
 0x3b8   :  { %1102 = vmatmul.mubr.msk.f32.vlgmr.msra.gmra.mxu1 %vm71_vm2, %v193_v34 }
 0x3b9   :  { %1116 = vmatpush3.msra.mxu1 %v1353_v1  ;;  %1123 = vmatprep.mubr.msk.f32.mxu1 %vm1304_vm0, %v1303_v0 }
 0x3ba   :  { %1117 = vmatprep.subr.mxu1 %v1303_v0 }
 0x3bb   :  { %1118 = vmatpush3.msra.mxu1 %v1355_v2 }
 0x3bc   :  { %1119 = vmatprep.subr.mxu1 %v1303_v0 }
 0x3bd   :  { %1120 = vmatpush3.msra.mxu1 %v1363_v4 }
 0x3be   :  { %1121 = vmatprep.subr.mxu1 %v1303_v0 }
 0x3bf   :  { %1122 = vmatpush3.msra.mxu1 %v1370_v5 }
 0x3c0   :  { %1137 = vmatprep.subr.mxu1 %v1303_v0 }
 0x478   :  { %v262_v35 = vpop.f32.mrf.mxu1 }
 0x479   :  { %v263_v36 = vadd.f32 %v1395_v7, %v262_v35 }
 0x47a   :  { %v1103_v37 = vpop.f32.mrf.mxu1 }
 0x47b   :  { %274 = vrot.lane.b32.xlu1 %v263_v36, %s1305_s8  ;;  %v266_v39 = vadd.f32 %v263_v36, %v190_v38  ;;  %v528_v36 = vsel %vm1029_vm9, 1, %v1306_v22 }
 0x47d   :  { %v1022_v40 = vmul.f32 -1.442695, %v266_v39 }
 0x47f   :  { %1189 = vpow2.f32 %v1022_v40 }
 0x48c   :  { %v1190_v41 = vpop.eup %1189 }
 0x48d   :  { %v270_v42 = vadd.f32 1.0, %v1190_v41 }
 0x48f   :  { %1191 = vrcp.f32 %v270_v42 }
 0x49c   :  { %v1192_v43 = vpop.eup %1191 }
 0x4ed   :  { %v275_v44 = vpop.permute.xlu1 %274 }
 0x4ee   :  { %v277_v45 = vmul.f32 %v1192_v43, %v275_v44 }
 0x4f0   :  { %279 = vrot.lane.b32.xlu0 %v277_v45, %s1305_s8 }
 0x4f4   :  { %300 = vperm.xlu0 %1182, %v298_v46  }
 0x562   :  { %v280_v47 = vpop.permute.xlu0 %279 }
 0x563   :  { %v282_v48 = vadd.f32 %v280_v47, %v190_v38 }
 0x565   :  { %1193 = vtanh.f32 %v282_v48 }
 0x56f   :  { %v301_v53 = vpop.permute.xlu0 %300 }
 0x570   :  { %vm302_vm6 = vcmp.eq.s32.totalorder %v301_v53, 1 }
 0x572   :  { %v1194_v49 = vpop.eup %1193 }
 0x573   :  { %v284_v50 = vsub.f32 %v188_v33, %v1194_v49 }
 0x575   :  { %286 = vrot.lane.b32.xlu1 %v284_v50, %s1307_s4 }
 0x5e7   :  { %v287_v51 = vpop.permute.xlu1 %286 }
 0x5e8   :  { %v289_v52 = vmul.f32 %v1192_v43, %v287_v51  ;;  %v535_v51 = vld [vmem:[#allocation3 + $0x8] sm:$0x3] }
 0x5ea   :  { %291 = vrot.lane.b32.xlu1 %v289_v52, %s1298_s21 }
 0x65c   :  { %v292_v54 = vpop.permute.xlu1 %291 }
 0x65d   :  { %v294_v55 = vadd.f32 %v1194_v49, %v292_v54 }
 0x65f   :  { %v303_v56 = vsel %vm302_vm6, %v294_v55, %v188_v33 }
 0x660   :  { %307 = vrot.lane.b32.xlu0 %v303_v56, %s1305_s8 }
 0x6d2   :  { %v308_v57 = vpop.permute.xlu0 %307 }
 0x6d3   :  { %1113 = vmatmul.mubr.msk.f32.vlgmr.msra.gmra.mxu0 %vm71_vm2, %v308_v57 }
 0x6d4   :  { %1127 = vmatpush3.msra.mxu0 %v1353_v1  ;;  %1134 = vmatprep.mubr.msk.f32.mxu0 %vm1304_vm0, %v1303_v0 }
 0x6d5   :  { %1128 = vmatprep.subr.mxu0 %v1303_v0 }
 0x6d6   :  { %1129 = vmatpush3.msra.mxu0 %v1355_v2 }
 0x6d7   :  { %1130 = vmatprep.subr.mxu0 %v1303_v0 }
 0x6d8   :  { %1131 = vmatpush3.msra.mxu0 %v1363_v4 }
 0x6d9   :  { %1132 = vmatprep.subr.mxu0 %v1303_v0 }
 0x6da   :  { %1133 = vmatpush3.msra.mxu0 %v1370_v5 }
 0x6db   :  { %1148 = vmatprep.subr.mxu0 %v1303_v0 }
 0x793   :  { %v377_v58 = vpop.f32.mrf.mxu0 }
 0x794   :  { %v378_v59 = vadd.f32 %v1395_v7, %v377_v58 }
 0x795   :  { %v1114_v60 = vpop.f32.mrf.mxu0 }
 0x796   :  { %389 = vrot.lane.b32.xlu1 %v378_v59, %s1305_s8  ;;  %v381_v62 = vadd.f32 %v378_v59, %v305_v61  ;;  %v643_v59 = vsel %vm1032_vm11, 1, %v1306_v22 }
 0x798   :  { %v1025_v63 = vmul.f32 -1.442695, %v381_v62 }
 0x79a   :  { %1195 = vpow2.f32 %v1025_v63 }
 0x7a7   :  { %v1196_v3 = vpop.eup %1195 }
 0x7a8   :  { %v385_v6 = vadd.f32 1.0, %v1196_v3 }
 0x7aa   :  { %1197 = vrcp.f32 %v385_v6 }
 0x7b7   :  { %v1198_v8 = vpop.eup %1197 }
 0x808   :  { %v390_v9 = vpop.permute.xlu1 %389 }
 0x809   :  { %v392_v10 = vmul.f32 %v1198_v8, %v390_v9 }
 0x80b   :  { %394 = vrot.lane.b32.xlu0 %v392_v10, %s1305_s8 }
 0x80f   :  { %415 = vperm.xlu0 %1182, %v413_v11  }
 0x87d   :  { %v395_v12 = vpop.permute.xlu0 %394 }
 0x87e   :  { %v397_v13 = vadd.f32 %v395_v12, %v305_v61 }
 0x880   :  { %1199 = vtanh.f32 %v397_v13 }
 0x88a   :  { %v416_v18 = vpop.permute.xlu0 %415 }
 0x88b   :  { %vm417_vm8 = vcmp.eq.s32.totalorder %v416_v18, 1 }
 0x88d   :  { %v1200_v14 = vpop.eup %1199 }
 0x88e   :  { %v399_v15 = vsub.f32 %v303_v56, %v1200_v14 }
 0x890   :  { %401 = vrot.lane.b32.xlu1 %v399_v15, %s1307_s4 }
 0x902   :  { %v402_v16 = vpop.permute.xlu1 %401 }
 0x903   :  { %v404_v17 = vmul.f32 %v1198_v8, %v402_v16 }
 0x905   :  { %406 = vrot.lane.b32.xlu1 %v404_v17, %s1298_s21 }
 0x977   :  { %v407_v19 = vpop.permute.xlu1 %406 }
 0x978   :  { %v409_v20 = vadd.f32 %v1200_v14, %v407_v19 }
 0x97a   :  { %v418_v23 = vsel %vm417_vm8, %v409_v20, %v303_v56 }
 0x97b   :  { %422 = vrot.lane.b32.xlu0 %v418_v23, %s1305_s8 }
 0x9ed   :  { %v423_v24 = vpop.permute.xlu0 %422 }
 0x9ee   :  { %1124 = vmatmul.mubr.msk.f32.vlgmr.msra.gmra.mxu1 %vm71_vm2, %v423_v24 }
 0x9ef   :  { %1138 = vmatpush3.msra.mxu1 %v1353_v1  ;;  %1145 = vmatprep.mubr.msk.f32.mxu1 %vm1304_vm0, %v1303_v0 }
 0x9f0   :  { %1139 = vmatprep.subr.mxu1 %v1303_v0 }
 0x9f1   :  { %1140 = vmatpush3.msra.mxu1 %v1355_v2 }
 0x9f2   :  { %1141 = vmatprep.subr.mxu1 %v1303_v0 }
 0x9f3   :  { %1142 = vmatpush3.msra.mxu1 %v1363_v4 }
 0x9f4   :  { %1143 = vmatprep.subr.mxu1 %v1303_v0 }
 0x9f5   :  { %1144 = vmatpush3.msra.mxu1 %v1370_v5 }
 0x9f6   :  { %1159 = vmatprep.subr.mxu1 %v1303_v0 }
 0xaae   :  { %v492_v25 = vpop.f32.mrf.mxu1 }
 0xaaf   :  { %v493_v26 = vadd.f32 %v1395_v7, %v492_v25 }
 0xab0   :  { %v1125_v27 = vpop.f32.mrf.mxu1 }
 0xab1   :  { %504 = vrot.lane.b32.xlu1 %v493_v26, %s1305_s8  ;;  %v496_v29 = vadd.f32 %v493_v26, %v420_v28 }
 0xab3   :  { %v1028_v30 = vmul.f32 -1.442695, %v496_v29 }
 0xab5   :  { %1201 = vpow2.f32 %v1028_v30 }
 0xac2   :  { %v1202_v31 = vpop.eup %1201 }
 0xac3   :  { %v500_v32 = vadd.f32 1.0, %v1202_v31 }
 0xac5   :  { %1203 = vrcp.f32 %v500_v32 }
 0xad2   :  { %v1204_v33 = vpop.eup %1203 }
 0xb23   :  { %v505_v34 = vpop.permute.xlu1 %504 }
 0xb24   :  { %v507_v35 = vmul.f32 %v1204_v33, %v505_v34 }
 0xb26   :  { %509 = vrot.lane.b32.xlu0 %v507_v35, %s1305_s8 }
 0xb2a   :  { %530 = vperm.xlu0 %1182, %v528_v36   ;;  %v765_v36 = vld [vmem:[#allocation3 + $0xc] sm:$0x3] }
 0xb98   :  { %v510_v37 = vpop.permute.xlu0 %509 }
 0xb99   :  { %v512_v38 = vadd.f32 %v510_v37, %v420_v28 }
 0xb9b   :  { %1205 = vtanh.f32 %v512_v38 }
 0xba5   :  { %v531_v43 = vpop.permute.xlu0 %530 }
 0xba6   :  { %vm532_vm10 = vcmp.eq.s32.totalorder %v531_v43, 1 }
 0xba8   :  { %v1206_v39 = vpop.eup %1205 }
 0xba9   :  { %v514_v40 = vsub.f32 %v418_v23, %v1206_v39 }
 0xbab   :  { %516 = vrot.lane.b32.xlu1 %v514_v40, %s1307_s4 }
 0xc1d   :  { %v517_v41 = vpop.permute.xlu1 %516 }
 0xc1e   :  { %v519_v42 = vmul.f32 %v1204_v33, %v517_v41 }
 0xc20   :  { %521 = vrot.lane.b32.xlu1 %v519_v42, %s1298_s21 }
 0xc92   :  { %v522_v44 = vpop.permute.xlu1 %521 }
 0xc93   :  { %v524_v45 = vadd.f32 %v1206_v39, %v522_v44  ;;  %v873_v44 = vsel %vm1038_vm15, 1, %v1306_v22 }
 0xc95   :  { %v533_v46 = vsel %vm532_vm10, %v524_v45, %v418_v23 }
 0xc96   :  { %537 = vrot.lane.b32.xlu0 %v533_v46, %s1305_s8 }
 0xd08   :  { %v538_v47 = vpop.permute.xlu0 %537 }
 0xd09   :  { %1135 = vmatmul.mubr.msk.f32.vlgmr.msra.gmra.mxu0 %vm71_vm2, %v538_v47 }
 0xd0a   :  { %1149 = vmatpush3.msra.mxu0 %v1353_v1  ;;  %1156 = vmatprep.mubr.msk.f32.mxu0 %vm1304_vm0, %v1303_v0 }
 0xd0b   :  { %1150 = vmatprep.subr.mxu0 %v1303_v0 }
 0xd0c   :  { %1151 = vmatpush3.msra.mxu0 %v1355_v2 }
 0xd0d   :  { %1152 = vmatprep.subr.mxu0 %v1303_v0 }
 0xd0e   :  { %1153 = vmatpush3.msra.mxu0 %v1363_v4 }
 0xd0f   :  { %1154 = vmatprep.subr.mxu0 %v1303_v0 }
 0xd10   :  { %1155 = vmatpush3.msra.mxu0 %v1370_v5 }
 0xdc9   :  { %v607_v48 = vpop.f32.mrf.mxu0 }
 0xdca   :  { %v608_v49 = vadd.f32 %v1395_v7, %v607_v48 }
 0xdcb   :  { %v1136_v50 = vpop.f32.mrf.mxu0 }
 0xdcc   :  { %619 = vrot.lane.b32.xlu1 %v608_v49, %s1305_s8  ;;  %v611_v52 = vadd.f32 %v608_v49, %v535_v51 }
 0xdce   :  { %v1031_v53 = vmul.f32 -1.442695, %v611_v52 }
 0xdd0   :  { %1207 = vpow2.f32 %v1031_v53 }
 0xddd   :  { %v1208_v54 = vpop.eup %1207 }
 0xdde   :  { %v615_v55 = vadd.f32 1.0, %v1208_v54 }
 0xde0   :  { %1209 = vrcp.f32 %v615_v55 }
 0xded   :  { %v1210_v56 = vpop.eup %1209 }
 0xe3e   :  { %v620_v57 = vpop.permute.xlu1 %619 }
 0xe3f   :  { %v622_v58 = vmul.f32 %v1210_v56, %v620_v57 }
 0xe41   :  { %624 = vrot.lane.b32.xlu0 %v622_v58, %s1305_s8 }
 0xe45   :  { %645 = vperm.xlu0 %1182, %v643_v59   ;;  %v880_v59 = vld [vmem:[#allocation3 + $0xe] sm:$0x3] }
 0xeb3   :  { %v625_v60 = vpop.permute.xlu0 %624 }
 0xeb4   :  { %v627_v61 = vadd.f32 %v625_v60, %v535_v51 }
 0xeb6   :  { %1211 = vtanh.f32 %v627_v61 }
 0xec0   :  { %v646_v8 = vpop.permute.xlu0 %645 }
 0xec1   :  { %vm647_vm12 = vcmp.eq.s32.totalorder %v646_v8, 1 }
 0xec3   :  { %v1212_v62 = vpop.eup %1211 }
 0xec4   :  { %v629_v63 = vsub.f32 %v533_v46, %v1212_v62 }
 0xec6   :  { %631 = vrot.lane.b32.xlu1 %v629_v63, %s1307_s4 }
 0xf38   :  { %v632_v3 = vpop.permute.xlu1 %631 }
 0xf39   :  { %v634_v6 = vmul.f32 %v1210_v56, %v632_v3 }
 0xf3b   :  { %636 = vrot.lane.b32.xlu1 %v634_v6, %s1298_s21 }
 0xfad   :  { %v637_v9 = vpop.permute.xlu1 %636 }
 0xfae   :  { %v639_v10 = vadd.f32 %v1212_v62, %v637_v9  ;;  %v988_v9 = vsel %vm1041_vm3, 1, %v1306_v22 }
 0xfb0   :  { %v648_v11 = vsel %vm647_vm12, %v639_v10, %v533_v46 }
 0xfb1   :  { %652 = vrot.lane.b32.xlu0 %v648_v11, %s1305_s8 }
0x1023   :  { %v653_v12 = vpop.permute.xlu0 %652 }
0x1024   :  { %1146 = vmatmul.mubr.msk.f32.vlgmr.msra.gmra.mxu1 %vm71_vm2, %v653_v12 }
0x1025   :  { %1160 = vmatpush3.msra.mxu1 %v1353_v1  ;;  %1167 = vmatprep.mubr.msk.f32.mxu1 %vm1304_vm0, %v1303_v0  ;;  %v650_v1 = vld [vmem:[#allocation3 + $0xa] sm:$0x3] }
0x1026   :  { %1161 = vmatprep.subr.mxu1 %v1303_v0 }
0x1027   :  { %1162 = vmatpush3.msra.mxu1 %v1355_v2 }
0x1028   :  { %1163 = vmatprep.subr.mxu1 %v1303_v0 }
0x1029   :  { %1164 = vmatpush3.msra.mxu1 %v1363_v4 }
0x102a   :  { %1165 = vmatprep.subr.mxu1 %v1303_v0  ;;  %v758_v0 = vsel %vm1035_vm13, 1, %v1306_v22 }
0x102b   :  { %1166 = vmatpush3.msra.mxu1 %v1370_v5 }
0x10e4   :  { %v722_v13 = vpop.f32.mrf.mxu1 }
0x10e5   :  { %v723_v14 = vadd.f32 %v1395_v7, %v722_v13 }
0x10e6   :  { %v1147_v15 = vpop.f32.mrf.mxu1 }
0x10e7   :  { %734 = vrot.lane.b32.xlu1 %v723_v14, %s1305_s8  ;;  %v726_v16 = vadd.f32 %v723_v14, %v650_v1 }
0x10e9   :  { %v1034_v17 = vmul.f32 -1.442695, %v726_v16 }
0x10eb   :  { %1213 = vpow2.f32 %v1034_v17 }
0x10f8   :  { %v1214_v18 = vpop.eup %1213 }
0x10f9   :  { %v730_v2 = vadd.f32 1.0, %v1214_v18 }
0x10fb   :  { %1215 = vrcp.f32 %v730_v2 }
0x1108   :  { %v1216_v19 = vpop.eup %1215 }
0x1159   :  { %v735_v20 = vpop.permute.xlu1 %734 }
0x115a   :  { %v737_v4 = vmul.f32 %v1216_v19, %v735_v20 }
0x115c   :  { %739 = vrot.lane.b32.xlu0 %v737_v4, %s1305_s8 }
0x1160   :  { %760 = vperm.xlu0 %1182, %v758_v0  }
0x11ce   :  { %v740_v5 = vpop.permute.xlu0 %739 }
0x11cf   :  { %v742_v23 = vadd.f32 %v740_v5, %v650_v1 }
0x11d1   :  { %1217 = vtanh.f32 %v742_v23 }
0x11db   :  { %v761_v28 = vpop.permute.xlu0 %760 }
0x11dc   :  { %vm762_vm14 = vcmp.eq.s32.totalorder %v761_v28, 1 }
0x11de   :  { %v1218_v24 = vpop.eup %1217 }
0x11df   :  { %v744_v25 = vsub.f32 %v648_v11, %v1218_v24 }
0x11e1   :  { %746 = vrot.lane.b32.xlu1 %v744_v25, %s1307_s4 }
0x1253   :  { %v747_v26 = vpop.permute.xlu1 %746 }
0x1254   :  { %v749_v27 = vmul.f32 %v1216_v19, %v747_v26 }
0x1256   :  { %751 = vrot.lane.b32.xlu1 %v749_v27, %s1298_s21 }
0x12c8   :  { %v752_v29 = vpop.permute.xlu1 %751 }
0x12c9   :  { %v754_v30 = vadd.f32 %v1218_v24, %v752_v29 }
0x12cb   :  { %v763_v31 = vsel %vm762_vm14, %v754_v30, %v648_v11 }
0x12cc   :  { %767 = vrot.lane.b32.xlu0 %v763_v31, %s1305_s8 }
0x133e   :  { %v768_v32 = vpop.permute.xlu0 %767 }
0x133f   :  { %1157 = vmatmul.mubr.msk.f32.vlgmr.msra.gmra.mxu0 %vm71_vm2, %v768_v32 }
0x13ff   :  { %v837_v33 = vpop.f32.mrf.mxu0 }
0x1400   :  { %v838_v34 = vadd.f32 %v1395_v7, %v837_v33 }
0x1401   :  { %v1158_v35 = vpop.f32.mrf.mxu0 }
0x1402   :  { %849 = vrot.lane.b32.xlu1 %v838_v34, %s1305_s8  ;;  %v841_v37 = vadd.f32 %v838_v34, %v765_v36 }
0x1404   :  { %v1037_v38 = vmul.f32 -1.442695, %v841_v37 }
0x1406   :  { %1219 = vpow2.f32 %v1037_v38 }
0x1413   :  { %v1220_v39 = vpop.eup %1219 }
0x1414   :  { %v845_v40 = vadd.f32 1.0, %v1220_v39 }
0x1416   :  { %1221 = vrcp.f32 %v845_v40 }
0x1423   :  { %v1222_v41 = vpop.eup %1221 }
0x1474   :  { %v850_v42 = vpop.permute.xlu1 %849 }
0x1475   :  { %v852_v43 = vmul.f32 %v1222_v41, %v850_v42 }
0x1477   :  { %854 = vrot.lane.b32.xlu0 %v852_v43, %s1305_s8 }
0x147b   :  { %875 = vperm.xlu0 %1182, %v873_v44  }
0x14e9   :  { %v855_v45 = vpop.permute.xlu0 %854 }
0x14ea   :  { %v857_v46 = vadd.f32 %v855_v45, %v765_v36 }
0x14ec   :  { %1223 = vtanh.f32 %v857_v46 }
0x14f6   :  { %v876_v51 = vpop.permute.xlu0 %875 }
0x14f7   :  { %vm877_vm0 = vcmp.eq.s32.totalorder %v876_v51, 1 }
0x14f9   :  { %v1224_v47 = vpop.eup %1223 }
0x14fa   :  { %v859_v48 = vsub.f32 %v763_v31, %v1224_v47 }
0x14fc   :  { %861 = vrot.lane.b32.xlu1 %v859_v48, %s1307_s4 }
0x156e   :  { %v862_v49 = vpop.permute.xlu1 %861 }
0x156f   :  { %v864_v50 = vmul.f32 %v1222_v41, %v862_v49 }
0x1571   :  { %866 = vrot.lane.b32.xlu1 %v864_v50, %s1298_s21 }
0x15e3   :  { %v867_v52 = vpop.permute.xlu1 %866 }
0x15e4   :  { %v869_v53 = vadd.f32 %v1224_v47, %v867_v52 }
0x15e6   :  { %v878_v54 = vsel %vm877_vm0, %v869_v53, %v763_v31 }
0x15e7   :  { %882 = vrot.lane.b32.xlu0 %v878_v54, %s1305_s8 }
0x1659   :  { %v883_v55 = vpop.permute.xlu0 %882 }
0x165a   :  { %1168 = vmatmul.mubr.msk.f32.vlgmr.msra.gmra.mxu1 %vm71_vm2, %v883_v55 }
0x171a   :  { %v952_v56 = vpop.f32.mrf.mxu1 }
0x171b   :  { %v953_v57 = vadd.f32 %v1395_v7, %v952_v56 }
0x171c   :  { %v1169_v58 = vpop.f32.mrf.mxu1 }
0x171d   :  { %964 = vrot.lane.b32.xlu1 %v953_v57, %s1305_s8  ;;  %v956_v60 = vadd.f32 %v953_v57, %v880_v59 }
0x171f   :  { %v1040_v61 = vmul.f32 -1.442695, %v956_v60 }
0x1721   :  { %1225 = vpow2.f32 %v1040_v61 }
0x172e   :  { %v1226_v62 = vpop.eup %1225 }
0x172f   :  { %v960_v63 = vadd.f32 1.0, %v1226_v62 }
0x1731   :  { %1227 = vrcp.f32 %v960_v63 }
0x173e   :  { %v1228_v3 = vpop.eup %1227 }
0x178f   :  { %v965_v6 = vpop.permute.xlu1 %964 }
0x1790   :  { %v967_v8 = vmul.f32 %v1228_v3, %v965_v6 }
0x1792   :  { %969 = vrot.lane.b32.xlu0 %v967_v8, %s1305_s8 }
0x1796   :  { %990 = vperm.xlu0 %1182, %v988_v9  }
0x1804   :  { %v970_v7 = vpop.permute.xlu0 %969 }
0x1805   :  { %v972_v10 = vadd.f32 %v970_v7, %v880_v59 }
0x1807   :  { %1229 = vtanh.f32 %v972_v10 }
0x1811   :  { %v991_v15 = vpop.permute.xlu0 %990 }
0x1812   :  { %vm992_vm2 = vcmp.eq.s32.totalorder %v991_v15, 1 }
0x1814   :  { %v1230_v11 = vpop.eup %1229 }
0x1815   :  { %v974_v12 = vsub.f32 %v878_v54, %v1230_v11 }
0x1817   :  { %976 = vrot.lane.b32.xlu1 %v974_v12, %s1307_s4 }
0x1889   :  { %v977_v13 = vpop.permute.xlu1 %976 }
0x188a   :  { %v979_v14 = vmul.f32 %v1228_v3, %v977_v13 }
0x188c   :  { %981 = vrot.lane.b32.xlu1 %v979_v14, %s1298_s21 }
0x18fe   :  { %v982_v1 = vpop.permute.xlu1 %981 }
0x18ff   :  { %v984_v16 = vadd.f32 %v1230_v11, %v982_v1 }
0x1901   :  { %v993_v21 = vsel %vm992_vm2, %v984_v16, %v878_v54 }
0x1902   :  { %995 = vrot.lane.b32.xlu0 %v993_v21, %s1305_s8 }
0x1974   :  { %v996_v22 = vpop.permute.xlu0 %995 }
0x1975   :  { %999 = vst.msk [vmem:[#allocation2] sm:$0x3] %vm54_vm1, %v996_v22  ;;  %1000 = vst.msk [vmem:[#allocation8] sm:$0x3] %vm54_vm1, %v996_v22 }
0x1976   :  { %1282 = shalt.err (!%p1279_p0)
}
0x1977   :  { %1010 = dma.vmem_to_hbm [thread:$0]  %s1008_s11, 32, %s1534_s5, [#allocation5]  }
0x1978   :  { %1295 = dma.done.wait [#allocation5], 32  }
0x1979   :  { %1296 = vsyncadd [#allocation5], 4294967264 }
0x197a   :  { %1014 = vsyncpa [#allocation4], 1 }
0x197b   :  { %1015 = vsyncpa [#allocation7], 1 }
0x197c   :  { %1016 = vsyncpa [#allocation5], 1 }

</bundles_post_ra>
